<compile_context>
chip_gen: v7x
topology: tpu7x:2x2x1
jax: 0.10.0
libtpu: 0.0.40
codegen_flags: <defaults>
</compile_context>

<pallas_src>
import functools
import math

import jax
import jax.numpy as jnp
from jax.experimental import pallas as pl
from jax.experimental.pallas import tpu as pltpu


def _round_up(x, m):
    return ((x + m - 1) // m) * m


def _aop_dop_kernel(inv_scale_ref, pred_ref, lab_ref,
                    dop_ref, aop_ref, s1_ref, s2_ref,
                    acc_dop, acc_aop, acc_s1, acc_s2,
                    *, eps, beta, ts, last_tile_valid, apply_mask):
    j = pl.program_id(2)
    nj = pl.num_programs(2)

    @pl.when(j == 0)
    def _init():
        acc_dop[...] = jnp.zeros_like(acc_dop)
        acc_aop[...] = jnp.zeros_like(acc_aop)
        acc_s1[...] = jnp.zeros_like(acc_s1)
        acc_s2[...] = jnp.zeros_like(acc_s2)

    inv_scale = inv_scale_ref[0, 0]            # f32 scalar from SMEM (= 1/labels.max())

    def clean(x):
        # divide-by-scale -> multiply by precomputed reciprocal.
        x = x.astype(jnp.float32) * inv_scale
        # nan_to_num(nan=eps) must precede clip (clip propagates NaN);
        # +/-inf are handled by the clip itself (inf -> 1-eps, -inf -> eps).
        x = jnp.where(jnp.isnan(x), eps, x)
        return jnp.clip(x, eps, 1.0 - eps)

    def sign(x):
        return jnp.where(x > 0.0, 1.0, jnp.where(x < 0.0, -1.0, 0.0))

    def stokes(ref):
        p0 = clean(ref[0, 0])                  # (ts, 128)
        p45 = clean(ref[0, 1])
        p90 = clean(ref[0, 2])
        p135 = clean(ref[0, 3])
        s0 = p0 + p90
        s1 = p0 - p90
        s2 = p45 - p135
        s1s = jnp.where(jnp.abs(s1) < eps, sign(s1) * eps, s1)
        s2s = jnp.where(jnp.abs(s2) < eps, sign(s2) * eps, s2)
        dop = jnp.clip(jnp.sqrt(s1 * s1 + s2 * s2 + eps) / (s0 + eps), 0.0, 1.0)
        return dop, s1, s2, s1s, s2s

    dop_p, s1_p, s2_p, s1s_p, s2s_p = stokes(pred_ref)
    dop_l, s1_l, s2_l, s1s_l, s2s_l = stokes(lab_ref)

    half_over_beta = 0.5 / beta
    half_beta = 0.5 * beta

    def smooth_l1(d):
        ad = jnp.abs(d)
        return jnp.where(ad < beta, half_over_beta * d * d, ad - half_beta)

    c_dop = smooth_l1(dop_p - dop_l)
    c_s1 = smooth_l1(s1_p - s1_l)
    c_s2 = smooth_l1(s2_p - s2_l)

    # Fused angle difference: one atan2 instead of two.
    #   aop_p - aop_l == 0.5*atan2(cross, dot)  (mod pi); the remainder wrap removes
    #   the multiple of pi, so |wrap(.)| is unchanged.
    cross = s2s_p * s1s_l - s1s_p * s2s_l
    dotp = s1s_p * s1s_l + s2s_p * s2s_l
    half_pi = 0.5 * math.pi
    inv_pi = 1.0 / math.pi
    d = 0.5 * jnp.arctan2(cross, dotp) + half_pi
    d = d - jnp.floor(d * inv_pi) * math.pi - half_pi   # remainder(d, pi), divisor > 0
    c_aop = jnp.abs(d)

    def accumulate(m_dop, m_aop, m_s1, m_s2):
        # (ts,128) -> (ts//8, 8, 128), reduce leading axis: cheap VPU vreg adds.
        acc_dop[...] += m_dop.reshape(-1, 8, 128).sum(axis=0)
        acc_aop[...] += m_aop.reshape(-1, 8, 128).sum(axis=0)
        acc_s1[...] += m_s1.reshape(-1, 8, 128).sum(axis=0)
        acc_s2[...] += m_s2.reshape(-1, 8, 128).sum(axis=0)

    if apply_mask:
        # Only the very last spatial tile can contain padding: mask it there only.
        is_last = jnp.logical_and(pl.program_id(1) == pl.num_programs(1) - 1,
                                  j == nj - 1)

        @pl.when(jnp.logical_not(is_last))
        def _acc_full():
            accumulate(c_dop, c_aop, c_s1, c_s2)

        @pl.when(is_last)
        def _acc_masked():
            row = jax.lax.broadcasted_iota(jnp.int32, (ts, 128), 0)
            lane = jax.lax.broadcasted_iota(jnp.int32, (ts, 128), 1)
            valid = (row * 128 + lane) < last_tile_valid
            zero = jnp.zeros_like(c_dop)
            accumulate(jnp.where(valid, c_dop, zero),
                       jnp.where(valid, c_aop, zero),
                       jnp.where(valid, c_s1, zero),
                       jnp.where(valid, c_s2, zero))
    else:
        accumulate(c_dop, c_aop, c_s1, c_s2)

    @pl.when(j == nj - 1)
    def _finalize():
        dop_ref[...] = jnp.sum(acc_dop[...]).reshape(1, 1, 1)
        aop_ref[...] = jnp.sum(acc_aop[...]).reshape(1, 1, 1)
        s1_ref[...] = jnp.sum(acc_s1[...]).reshape(1, 1, 1)
        s2_ref[...] = jnp.sum(acc_s2[...]).reshape(1, 1, 1)


@functools.partial(jax.jit, static_argnames=("eps", "beta", "ts_max"))
def loss_aop_dop(outputs, labels, *, eps=1e-6, beta=0.2, ts_max=1024):
    """Forward pass of Loss_AOP_DOP. Returns (error_dop, error_aop, error_S1, error_S2)."""
    assert outputs.shape == labels.shape
    b, c, h, w = labels.shape
    assert c == 4, "Loss_AOP_DOP expects 4 polarization channels (0/45/90/135)"

    hw = h * w
    n_lane = -(-hw // 128)                       # 128-wide lane groups (ceil)
    ts = min(ts_max, _round_up(n_lane, 8))       # sublane tile (multiple of 8)
    n_lane_p = _round_up(n_lane, ts)
    hwp = n_lane_p * 128
    n_tiles = n_lane_p // ts
    # Extra spatial parallel split so both v7x TensorCores are used at small B.
    n_split = 2 if (n_tiles >= 2 and n_tiles % 2 == 0) else 1
    n_j = n_tiles // n_split

    # Global labels.max() — single XLA reduce in the same jit as the kernel; its
    # reciprocal is passed to the kernel via SMEM so the normalization is 1 mul/elem.
    inv_scale = (1.0 / jnp.max(labels).astype(jnp.float32)).reshape(1, 1)

    pred = outputs.reshape(b, c, hw)
    lab = labels.reshape(b, c, hw)
    if hwp != hw:
        pad = ((0, 0), (0, 0), (0, hwp - hw))
        pred = jnp.pad(pred, pad)
        lab = jnp.pad(lab, pad)
    pred = pred.reshape(b, c, n_lane_p, 128)
    lab = lab.reshape(b, c, n_lane_p, 128)

    apply_mask = (hwp != hw)
    last_tile_valid = hw - (n_tiles - 1) * ts * 128   # valid elems in the last tile

    kernel = functools.partial(
        _aop_dop_kernel, eps=float(eps), beta=float(beta),
        ts=ts, last_tile_valid=last_tile_valid, apply_mask=apply_mask)

    out_struct = jax.ShapeDtypeStruct((b * n_split, 1, 1), jnp.float32)
    block_in = pl.BlockSpec((1, c, ts, 128),
                            lambda bb, s, j: (bb, 0, s * n_j + j, 0))
    block_out = pl.BlockSpec((1, 1, 1),
                             lambda bb, s, j: (bb * n_split + s, 0, 0))
    smem_spec = pl.BlockSpec(memory_space=pltpu.MemorySpace.SMEM)

    sums = pl.pallas_call(
        kernel,
        out_shape=(out_struct,) * 4,
        grid=(b, n_split, n_j),
        in_specs=[smem_spec, block_in, block_in],
        out_specs=(block_out,) * 4,
        scratch_shapes=[pltpu.VMEM((8, 128), jnp.float32) for _ in range(4)],
        compiler_params=pltpu.CompilerParams(
            dimension_semantics=("parallel", "parallel", "arbitrary"),
            vmem_limit_bytes=48 * 1024 * 1024),
    )(inv_scale, pred, lab)

    n = float(b * h * w)
    e_dop, e_aop, e_s1, e_s2 = (jnp.sum(s) / n for s in sums)
    return e_dop, e_aop, e_s1, e_s2


def _loss_aop_dop_ref(outputs, labels, eps=1e-6, beta=0.2):
    """Pure-JAX reference mirroring the PyTorch forward."""
    labels_max = jnp.max(labels)
    labels = labels / labels_max
    outputs = outputs / labels_max

    def clean(x):
        x = jnp.nan_to_num(x, nan=eps, posinf=1.0 - eps, neginf=eps)
        return jnp.clip(x, eps, 1.0 - eps)

    outputs = clean(outputs)
    labels = clean(labels)

    def get_aop_dop(p):
        p0, p45, p90, p135 = p[:, 0], p[:, 1], p[:, 2], p[:, 3]
        s0 = p0 + p90
        s1 = p0 - p90
        s2 = p45 - p135
        s1s = jnp.where(jnp.abs(s1) < eps, jnp.sign(s1) * eps, s1)
        s2s = jnp.where(jnp.abs(s2) < eps, jnp.sign(s2) * eps, s2)
        aop = 0.5 * jnp.arctan2(s2s, s1s)
        dop = jnp.clip(jnp.sqrt(s1 ** 2 + s2 ** 2 + eps) / (s0 + eps), 0.0, 1.0)
        return dop, aop, s1, s2

    od, oa, os1, os2 = get_aop_dop(outputs)
    ld, la, ls1, ls2 = get_aop_dop(labels)

    def smooth_l1(x, y):
        d = x - y
        ad = jnp.abs(d)
        return jnp.mean(jnp.where(ad < beta, 0.5 * d * d / beta, ad - 0.5 * beta))

    e_s1 = smooth_l1(os1, ls1)
    e_s2 = smooth_l1(os2, ls2)
    e_dop = smooth_l1(od, ld)
    diff = jnp.remainder(oa - la + 0.5 * math.pi, math.pi) - 0.5 * math.pi
    e_aop = jnp.mean(jnp.abs(diff))
    return e_dop, e_aop, e_s1, e_s2


if __name__ == "__main__":
    key = jax.random.PRNGKey(0)
    k1, k2 = jax.random.split(key)

    b, c, h, w = 2, 4, 16, 16
    outputs = jax.random.uniform(k1, (b, c, h, w), dtype=jnp.float32)
    labels = 2.0 * jax.random.uniform(k2, (b, c, h, w), dtype=jnp.float32)

    res = loss_aop_dop(outputs, labels)
    res = jax.block_until_ready(res)
    ref = _loss_aop_dop_ref(outputs, labels)

    names = ("error_dop", "error_aop", "error_S1", "error_S2")
    for name, got, want in zip(names, res, ref):
        assert jnp.allclose(got, want, rtol=1e-4, atol=1e-5), (name, float(got), float(want))

    print("KERNEL_OK")
</pallas_src>

<mosaic_0001>
module attributes {stable_mosaic.version = 11 : i64} {
  func.func @_aop_dop_kernel(%arg0: i32, %arg1: i32, %arg2: i32, %arg3: memref<1x1xf32, #tpu.memory_space<smem>>, %arg4: memref<1x4x8x128xf32, #tpu.memory_space<vmem>>, %arg5: memref<1x4x8x128xf32, #tpu.memory_space<vmem>>, %arg6: memref<1x1x1xf32, #tpu.memory_space<vmem>>, %arg7: memref<1x1x1xf32, #tpu.memory_space<vmem>>, %arg8: memref<1x1x1xf32, #tpu.memory_space<vmem>>, %arg9: memref<1x1x1xf32, #tpu.memory_space<vmem>>, %arg10: memref<8x128xf32, #tpu.memory_space<vmem>>, %arg11: memref<8x128xf32, #tpu.memory_space<vmem>>, %arg12: memref<8x128xf32, #tpu.memory_space<vmem>>, %arg13: memref<8x128xf32, #tpu.memory_space<vmem>>) attributes {dimension_semantics = [#tpu.dimension_semantics<parallel>, #tpu.dimension_semantics<parallel>, #tpu.dimension_semantics<arbitrary>], iteration_bounds = array<i64: 2, 1, 1>, scalar_prefetch = 0 : i64, scratch_operands = 4 : i64, tpu.core_type = #tpu.core_type<tc>, window_params = [{transform_indices = @transform_0, window_bounds = array<i64: 1, 1>}, {transform_indices = @transform_1, window_bounds = array<i64: 1, 4, 8, 128>}, {transform_indices = @transform_2, window_bounds = array<i64: 1, 4, 8, 128>}, {transform_indices = @transform_3, window_bounds = array<i64: 1, 1, 1>}, {transform_indices = @transform_4, window_bounds = array<i64: 1, 1, 1>}, {transform_indices = @transform_5, window_bounds = array<i64: 1, 1, 1>}, {transform_indices = @transform_6, window_bounds = array<i64: 1, 1, 1>}]} {
    %c0_i32 = arith.constant 0 : i32
    %0 = arith.cmpi eq, %arg2, %c0_i32 : i32
    %1 = arith.extui %0 : i1 to i32
    %c0_i32_0 = arith.constant 0 : i32
    %2 = arith.cmpi ne, %1, %c0_i32_0 : i32
    scf.if %2 {
      %cst_110 = arith.constant 0.000000e+00 : f32
      %245 = vector.broadcast %cst_110 : f32 to vector<8x128xf32>
      %c0_111 = arith.constant 0 : index
      %c0_112 = arith.constant 0 : index
      %246 = vector.load %arg10[%c0_111, %c0_112] : memref<8x128xf32, #tpu.memory_space<vmem>>, vector<8x128xf32>
      tpu.vector_store %arg10[%c0_111, %c0_112], %245 {strides = array<i32>} : memref<8x128xf32, #tpu.memory_space<vmem>>, vector<8x128xf32>,
      %cst_113 = arith.constant 0.000000e+00 : f32
      %247 = vector.broadcast %cst_113 : f32 to vector<8x128xf32>
      %c0_114 = arith.constant 0 : index
      %c0_115 = arith.constant 0 : index
      %248 = vector.load %arg11[%c0_114, %c0_115] : memref<8x128xf32, #tpu.memory_space<vmem>>, vector<8x128xf32>
      tpu.vector_store %arg11[%c0_114, %c0_115], %247 {strides = array<i32>} : memref<8x128xf32, #tpu.memory_space<vmem>>, vector<8x128xf32>,
      %cst_116 = arith.constant 0.000000e+00 : f32
      %249 = vector.broadcast %cst_116 : f32 to vector<8x128xf32>
      %c0_117 = arith.constant 0 : index
      %c0_118 = arith.constant 0 : index
      %250 = vector.load %arg12[%c0_117, %c0_118] : memref<8x128xf32, #tpu.memory_space<vmem>>, vector<8x128xf32>
      tpu.vector_store %arg12[%c0_117, %c0_118], %249 {strides = array<i32>} : memref<8x128xf32, #tpu.memory_space<vmem>>, vector<8x128xf32>,
      %cst_119 = arith.constant 0.000000e+00 : f32
      %251 = vector.broadcast %cst_119 : f32 to vector<8x128xf32>
      %c0_120 = arith.constant 0 : index
      %c0_121 = arith.constant 0 : index
      %252 = vector.load %arg13[%c0_120, %c0_121] : memref<8x128xf32, #tpu.memory_space<vmem>>, vector<8x128xf32>
      tpu.vector_store %arg13[%c0_120, %c0_121], %251 {strides = array<i32>} : memref<8x128xf32, #tpu.memory_space<vmem>>, vector<8x128xf32>,
    } else {
    }
    %c0 = arith.constant 0 : index
    %c0_1 = arith.constant 0 : index
    %3 = memref.load %arg3[%c0, %c0_1] : memref<1x1xf32, #tpu.memory_space<smem>>
    %c0_2 = arith.constant 0 : index
    %c0_3 = arith.constant 0 : index
    %c0_4 = arith.constant 0 : index
    %c0_5 = arith.constant 0 : index
    %4 = vector.load %arg4[%c0_2, %c0_3, %c0_4, %c0_5] : memref<1x4x8x128xf32, #tpu.memory_space<vmem>>, vector<1x1x8x128xf32>
    %5 = vector.shape_cast %4 : vector<1x1x8x128xf32> to vector<8x128xf32>
    %6 = vector.broadcast %3 : f32 to vector<8x128xf32>
    %7 = arith.mulf %5, %6 : vector<8x128xf32>
    %8 = arith.cmpf one, %7, %7 : vector<8x128xf32>
    %cst = arith.constant 9.99999997E-7 : f32
    %9 = vector.broadcast %cst : f32 to vector<8x128xf32>
    %10 = arith.select %8, %9, %7 : vector<8x128xi1>, vector<8x128xf32>
    %cst_6 = arith.constant 9.99999997E-7 : f32
    %cst_7 = arith.constant 0.999998986 : f32
    %11 = vector.broadcast %cst_6 : f32 to vector<8x128xf32>
    %12 = arith.maximumf %11, %10 : vector<8x128xf32>
    %13 = vector.broadcast %cst_7 : f32 to vector<8x128xf32>
    %14 = arith.minimumf %13, %12 : vector<8x128xf32>
    %c0_8 = arith.constant 0 : index
    %c1 = arith.constant 1 : index
    %c0_9 = arith.constant 0 : index
    %c0_10 = arith.constant 0 : index
    %15 = vector.load %arg4[%c0_8, %c1, %c0_9, %c0_10] : memref<1x4x8x128xf32, #tpu.memory_space<vmem>>, vector<1x1x8x128xf32>
    %16 = vector.shape_cast %15 : vector<1x1x8x128xf32> to vector<8x128xf32>
    %17 = vector.broadcast %3 : f32 to vector<8x128xf32>
    %18 = arith.mulf %16, %17 : vector<8x128xf32>
    %19 = arith.cmpf one, %18, %18 : vector<8x128xf32>
    %cst_11 = arith.constant 9.99999997E-7 : f32
    %20 = vector.broadcast %cst_11 : f32 to vector<8x128xf32>
    %21 = arith.select %19, %20, %18 : vector<8x128xi1>, vector<8x128xf32>
    %cst_12 = arith.constant 9.99999997E-7 : f32
    %cst_13 = arith.constant 0.999998986 : f32
    %22 = vector.broadcast %cst_12 : f32 to vector<8x128xf32>
    %23 = arith.maximumf %22, %21 : vector<8x128xf32>
    %24 = vector.broadcast %cst_13 : f32 to vector<8x128xf32>
    %25 = arith.minimumf %24, %23 : vector<8x128xf32>
    %c0_14 = arith.constant 0 : index
    %c2 = arith.constant 2 : index
    %c0_15 = arith.constant 0 : index
    %c0_16 = arith.constant 0 : index
    %26 = vector.load %arg4[%c0_14, %c2, %c0_15, %c0_16] : memref<1x4x8x128xf32, #tpu.memory_space<vmem>>, vector<1x1x8x128xf32>
    %27 = vector.shape_cast %26 : vector<1x1x8x128xf32> to vector<8x128xf32>
    %28 = vector.broadcast %3 : f32 to vector<8x128xf32>
    %29 = arith.mulf %27, %28 : vector<8x128xf32>
    %30 = arith.cmpf one, %29, %29 : vector<8x128xf32>
    %cst_17 = arith.constant 9.99999997E-7 : f32
    %31 = vector.broadcast %cst_17 : f32 to vector<8x128xf32>
    %32 = arith.select %30, %31, %29 : vector<8x128xi1>, vector<8x128xf32>
    %cst_18 = arith.constant 9.99999997E-7 : f32
    %cst_19 = arith.constant 0.999998986 : f32
    %33 = vector.broadcast %cst_18 : f32 to vector<8x128xf32>
    %34 = arith.maximumf %33, %32 : vector<8x128xf32>
    %35 = vector.broadcast %cst_19 : f32 to vector<8x128xf32>
    %36 = arith.minimumf %35, %34 : vector<8x128xf32>
    %c0_20 = arith.constant 0 : index
    %c3 = arith.constant 3 : index
    %c0_21 = arith.constant 0 : index
    %c0_22 = arith.constant 0 : index
    %37 = vector.load %arg4[%c0_20, %c3, %c0_21, %c0_22] : memref<1x4x8x128xf32, #tpu.memory_space<vmem>>, vector<1x1x8x128xf32>
    %38 = vector.shape_cast %37 : vector<1x1x8x128xf32> to vector<8x128xf32>
    %39 = vector.broadcast %3 : f32 to vector<8x128xf32>
    %40 = arith.mulf %38, %39 : vector<8x128xf32>
    %41 = arith.cmpf one, %40, %40 : vector<8x128xf32>
    %cst_23 = arith.constant 9.99999997E-7 : f32
    %42 = vector.broadcast %cst_23 : f32 to vector<8x128xf32>
    %43 = arith.select %41, %42, %40 : vector<8x128xi1>, vector<8x128xf32>
    %cst_24 = arith.constant 9.99999997E-7 : f32
    %cst_25 = arith.constant 0.999998986 : f32
    %44 = vector.broadcast %cst_24 : f32 to vector<8x128xf32>
    %45 = arith.maximumf %44, %43 : vector<8x128xf32>
    %46 = vector.broadcast %cst_25 : f32 to vector<8x128xf32>
    %47 = arith.minimumf %46, %45 : vector<8x128xf32>
    %48 = arith.addf %14, %36 : vector<8x128xf32>
    %49 = arith.subf %14, %36 : vector<8x128xf32>
    %50 = arith.subf %25, %47 : vector<8x128xf32>
    %51 = math.absf %49 : vector<8x128xf32>
    %cst_26 = arith.constant 9.99999997E-7 : f32
    %52 = vector.broadcast %cst_26 : f32 to vector<8x128xf32>
    %53 = arith.cmpf olt, %51, %52 : vector<8x128xf32>
    %cst_27 = arith.constant 0.000000e+00 : f32
    %54 = vector.broadcast %cst_27 : f32 to vector<8x128xf32>
    %55 = arith.cmpf ogt, %49, %54 : vector<8x128xf32>
    %cst_28 = arith.constant 0.000000e+00 : f32
    %56 = vector.broadcast %cst_28 : f32 to vector<8x128xf32>
    %57 = arith.cmpf olt, %49, %56 : vector<8x128xf32>
    %cst_29 = arith.constant -1.000000e+00 : f32
    %cst_30 = arith.constant 0.000000e+00 : f32
    %58 = vector.broadcast %cst_29 : f32 to vector<8x128xf32>
    %59 = vector.broadcast %cst_30 : f32 to vector<8x128xf32>
    %60 = arith.select %57, %58, %59 : vector<8x128xi1>, vector<8x128xf32>
    %cst_31 = arith.constant 1.000000e+00 : f32
    %61 = vector.broadcast %cst_31 : f32 to vector<8x128xf32>
    %62 = arith.select %55, %61, %60 : vector<8x128xi1>, vector<8x128xf32>
    %cst_32 = arith.constant 9.99999997E-7 : f32
    %63 = vector.broadcast %cst_32 : f32 to vector<8x128xf32>
    %64 = arith.mulf %62, %63 : vector<8x128xf32>
    %65 = arith.select %53, %64, %49 : vector<8x128xi1>, vector<8x128xf32>
    %66 = math.absf %50 : vector<8x128xf32>
    %cst_33 = arith.constant 9.99999997E-7 : f32
    %67 = vector.broadcast %cst_33 : f32 to vector<8x128xf32>
    %68 = arith.cmpf olt, %66, %67 : vector<8x128xf32>
    %cst_34 = arith.constant 0.000000e+00 : f32
    %69 = vector.broadcast %cst_34 : f32 to vector<8x128xf32>
    %70 = arith.cmpf ogt, %50, %69 : vector<8x128xf32>
    %cst_35 = arith.constant 0.000000e+00 : f32
    %71 = vector.broadcast %cst_35 : f32 to vector<8x128xf32>
    %72 = arith.cmpf olt, %50, %71 : vector<8x128xf32>
    %cst_36 = arith.constant -1.000000e+00 : f32
    %cst_37 = arith.constant 0.000000e+00 : f32
    %73 = vector.broadcast %cst_36 : f32 to vector<8x128xf32>
    %74 = vector.broadcast %cst_37 : f32 to vector<8x128xf32>
    %75 = arith.select %72, %73, %74 : vector<8x128xi1>, vector<8x128xf32>
    %cst_38 = arith.constant 1.000000e+00 : f32
    %76 = vector.broadcast %cst_38 : f32 to vector<8x128xf32>
    %77 = arith.select %70, %76, %75 : vector<8x128xi1>, vector<8x128xf32>
    %cst_39 = arith.constant 9.99999997E-7 : f32
    %78 = vector.broadcast %cst_39 : f32 to vector<8x128xf32>
    %79 = arith.mulf %77, %78 : vector<8x128xf32>
    %80 = arith.select %68, %79, %50 : vector<8x128xi1>, vector<8x128xf32>
    %81 = arith.mulf %49, %49 : vector<8x128xf32>
    %82 = arith.mulf %50, %50 : vector<8x128xf32>
    %83 = arith.addf %81, %82 : vector<8x128xf32>
    %cst_40 = arith.constant 9.99999997E-7 : f32
    %84 = vector.broadcast %cst_40 : f32 to vector<8x128xf32>
    %85 = arith.addf %83, %84 : vector<8x128xf32>
    %86 = math.sqrt %85 : vector<8x128xf32>
    %cst_41 = arith.constant 9.99999997E-7 : f32
    %87 = vector.broadcast %cst_41 : f32 to vector<8x128xf32>
    %88 = arith.addf %48, %87 : vector<8x128xf32>
    %89 = arith.divf %86, %88 : vector<8x128xf32>
    %cst_42 = arith.constant 0.000000e+00 : f32
    %cst_43 = arith.constant 1.000000e+00 : f32
    %90 = vector.broadcast %cst_42 : f32 to vector<8x128xf32>
    %91 = arith.maximumf %90, %89 : vector<8x128xf32>
    %92 = vector.broadcast %cst_43 : f32 to vector<8x128xf32>
    %93 = arith.minimumf %92, %91 : vector<8x128xf32>
    %c0_44 = arith.constant 0 : index
    %c0_45 = arith.constant 0 : index
    %c0_46 = arith.constant 0 : index
    %c0_47 = arith.constant 0 : index
    %94 = vector.load %arg5[%c0_44, %c0_45, %c0_46, %c0_47] : memref<1x4x8x128xf32, #tpu.memory_space<vmem>>, vector<1x1x8x128xf32>
    %95 = vector.shape_cast %94 : vector<1x1x8x128xf32> to vector<8x128xf32>
    %96 = vector.broadcast %3 : f32 to vector<8x128xf32>
    %97 = arith.mulf %95, %96 : vector<8x128xf32>
    %98 = arith.cmpf one, %97, %97 : vector<8x128xf32>
    %cst_48 = arith.constant 9.99999997E-7 : f32
    %99 = vector.broadcast %cst_48 : f32 to vector<8x128xf32>
    %100 = arith.select %98, %99, %97 : vector<8x128xi1>, vector<8x128xf32>
    %cst_49 = arith.constant 9.99999997E-7 : f32
    %cst_50 = arith.constant 0.999998986 : f32
    %101 = vector.broadcast %cst_49 : f32 to vector<8x128xf32>
    %102 = arith.maximumf %101, %100 : vector<8x128xf32>
    %103 = vector.broadcast %cst_50 : f32 to vector<8x128xf32>
    %104 = arith.minimumf %103, %102 : vector<8x128xf32>
    %c0_51 = arith.constant 0 : index
    %c1_52 = arith.constant 1 : index
    %c0_53 = arith.constant 0 : index
    %c0_54 = arith.constant 0 : index
    %105 = vector.load %arg5[%c0_51, %c1_52, %c0_53, %c0_54] : memref<1x4x8x128xf32, #tpu.memory_space<vmem>>, vector<1x1x8x128xf32>
    %106 = vector.shape_cast %105 : vector<1x1x8x128xf32> to vector<8x128xf32>
    %107 = vector.broadcast %3 : f32 to vector<8x128xf32>
    %108 = arith.mulf %106, %107 : vector<8x128xf32>
    %109 = arith.cmpf one, %108, %108 : vector<8x128xf32>
    %cst_55 = arith.constant 9.99999997E-7 : f32
    %110 = vector.broadcast %cst_55 : f32 to vector<8x128xf32>
    %111 = arith.select %109, %110, %108 : vector<8x128xi1>, vector<8x128xf32>
    %cst_56 = arith.constant 9.99999997E-7 : f32
    %cst_57 = arith.constant 0.999998986 : f32
    %112 = vector.broadcast %cst_56 : f32 to vector<8x128xf32>
    %113 = arith.maximumf %112, %111 : vector<8x128xf32>
    %114 = vector.broadcast %cst_57 : f32 to vector<8x128xf32>
    %115 = arith.minimumf %114, %113 : vector<8x128xf32>
    %c0_58 = arith.constant 0 : index
    %c2_59 = arith.constant 2 : index
    %c0_60 = arith.constant 0 : index
    %c0_61 = arith.constant 0 : index
    %116 = vector.load %arg5[%c0_58, %c2_59, %c0_60, %c0_61] : memref<1x4x8x128xf32, #tpu.memory_space<vmem>>, vector<1x1x8x128xf32>
    %117 = vector.shape_cast %116 : vector<1x1x8x128xf32> to vector<8x128xf32>
    %118 = vector.broadcast %3 : f32 to vector<8x128xf32>
    %119 = arith.mulf %117, %118 : vector<8x128xf32>
    %120 = arith.cmpf one, %119, %119 : vector<8x128xf32>
    %cst_62 = arith.constant 9.99999997E-7 : f32
    %121 = vector.broadcast %cst_62 : f32 to vector<8x128xf32>
    %122 = arith.select %120, %121, %119 : vector<8x128xi1>, vector<8x128xf32>
    %cst_63 = arith.constant 9.99999997E-7 : f32
    %cst_64 = arith.constant 0.999998986 : f32
    %123 = vector.broadcast %cst_63 : f32 to vector<8x128xf32>
    %124 = arith.maximumf %123, %122 : vector<8x128xf32>
    %125 = vector.broadcast %cst_64 : f32 to vector<8x128xf32>
    %126 = arith.minimumf %125, %124 : vector<8x128xf32>
    %c0_65 = arith.constant 0 : index
    %c3_66 = arith.constant 3 : index
    %c0_67 = arith.constant 0 : index
    %c0_68 = arith.constant 0 : index
    %127 = vector.load %arg5[%c0_65, %c3_66, %c0_67, %c0_68] : memref<1x4x8x128xf32, #tpu.memory_space<vmem>>, vector<1x1x8x128xf32>
    %128 = vector.shape_cast %127 : vector<1x1x8x128xf32> to vector<8x128xf32>
    %129 = vector.broadcast %3 : f32 to vector<8x128xf32>
    %130 = arith.mulf %128, %129 : vector<8x128xf32>
    %131 = arith.cmpf one, %130, %130 : vector<8x128xf32>
    %cst_69 = arith.constant 9.99999997E-7 : f32
    %132 = vector.broadcast %cst_69 : f32 to vector<8x128xf32>
    %133 = arith.select %131, %132, %130 : vector<8x128xi1>, vector<8x128xf32>
    %cst_70 = arith.constant 9.99999997E-7 : f32
    %cst_71 = arith.constant 0.999998986 : f32
    %134 = vector.broadcast %cst_70 : f32 to vector<8x128xf32>
    %135 = arith.maximumf %134, %133 : vector<8x128xf32>
    %136 = vector.broadcast %cst_71 : f32 to vector<8x128xf32>
    %137 = arith.minimumf %136, %135 : vector<8x128xf32>
    %138 = arith.addf %104, %126 : vector<8x128xf32>
    %139 = arith.subf %104, %126 : vector<8x128xf32>
    %140 = arith.subf %115, %137 : vector<8x128xf32>
    %141 = math.absf %139 : vector<8x128xf32>
    %cst_72 = arith.constant 9.99999997E-7 : f32
    %142 = vector.broadcast %cst_72 : f32 to vector<8x128xf32>
    %143 = arith.cmpf olt, %141, %142 : vector<8x128xf32>
    %cst_73 = arith.constant 0.000000e+00 : f32
    %144 = vector.broadcast %cst_73 : f32 to vector<8x128xf32>
    %145 = arith.cmpf ogt, %139, %144 : vector<8x128xf32>
    %cst_74 = arith.constant 0.000000e+00 : f32
    %146 = vector.broadcast %cst_74 : f32 to vector<8x128xf32>
    %147 = arith.cmpf olt, %139, %146 : vector<8x128xf32>
    %cst_75 = arith.constant -1.000000e+00 : f32
    %cst_76 = arith.constant 0.000000e+00 : f32
    %148 = vector.broadcast %cst_75 : f32 to vector<8x128xf32>
    %149 = vector.broadcast %cst_76 : f32 to vector<8x128xf32>
    %150 = arith.select %147, %148, %149 : vector<8x128xi1>, vector<8x128xf32>
    %cst_77 = arith.constant 1.000000e+00 : f32
    %151 = vector.broadcast %cst_77 : f32 to vector<8x128xf32>
    %152 = arith.select %145, %151, %150 : vector<8x128xi1>, vector<8x128xf32>
    %cst_78 = arith.constant 9.99999997E-7 : f32
    %153 = vector.broadcast %cst_78 : f32 to vector<8x128xf32>
    %154 = arith.mulf %152, %153 : vector<8x128xf32>
    %155 = arith.select %143, %154, %139 : vector<8x128xi1>, vector<8x128xf32>
    %156 = math.absf %140 : vector<8x128xf32>
    %cst_79 = arith.constant 9.99999997E-7 : f32
    %157 = vector.broadcast %cst_79 : f32 to vector<8x128xf32>
    %158 = arith.cmpf olt, %156, %157 : vector<8x128xf32>
    %cst_80 = arith.constant 0.000000e+00 : f32
    %159 = vector.broadcast %cst_80 : f32 to vector<8x128xf32>
    %160 = arith.cmpf ogt, %140, %159 : vector<8x128xf32>
    %cst_81 = arith.constant 0.000000e+00 : f32
    %161 = vector.broadcast %cst_81 : f32 to vector<8x128xf32>
    %162 = arith.cmpf olt, %140, %161 : vector<8x128xf32>
    %cst_82 = arith.constant -1.000000e+00 : f32
    %cst_83 = arith.constant 0.000000e+00 : f32
    %163 = vector.broadcast %cst_82 : f32 to vector<8x128xf32>
    %164 = vector.broadcast %cst_83 : f32 to vector<8x128xf32>
    %165 = arith.select %162, %163, %164 : vector<8x128xi1>, vector<8x128xf32>
    %cst_84 = arith.constant 1.000000e+00 : f32
    %166 = vector.broadcast %cst_84 : f32 to vector<8x128xf32>
    %167 = arith.select %160, %166, %165 : vector<8x128xi1>, vector<8x128xf32>
    %cst_85 = arith.constant 9.99999997E-7 : f32
    %168 = vector.broadcast %cst_85 : f32 to vector<8x128xf32>
    %169 = arith.mulf %167, %168 : vector<8x128xf32>
    %170 = arith.select %158, %169, %140 : vector<8x128xi1>, vector<8x128xf32>
    %171 = arith.mulf %139, %139 : vector<8x128xf32>
    %172 = arith.mulf %140, %140 : vector<8x128xf32>
    %173 = arith.addf %171, %172 : vector<8x128xf32>
    %cst_86 = arith.constant 9.99999997E-7 : f32
    %174 = vector.broadcast %cst_86 : f32 to vector<8x128xf32>
    %175 = arith.addf %173, %174 : vector<8x128xf32>
    %176 = math.sqrt %175 : vector<8x128xf32>
    %cst_87 = arith.constant 9.99999997E-7 : f32
    %177 = vector.broadcast %cst_87 : f32 to vector<8x128xf32>
    %178 = arith.addf %138, %177 : vector<8x128xf32>
    %179 = arith.divf %176, %178 : vector<8x128xf32>
    %cst_88 = arith.constant 0.000000e+00 : f32
    %cst_89 = arith.constant 1.000000e+00 : f32
    %180 = vector.broadcast %cst_88 : f32 to vector<8x128xf32>
    %181 = arith.maximumf %180, %179 : vector<8x128xf32>
    %182 = vector.broadcast %cst_89 : f32 to vector<8x128xf32>
    %183 = arith.minimumf %182, %181 : vector<8x128xf32>
    %184 = arith.subf %93, %183 : vector<8x128xf32>
    %185 = math.absf %184 : vector<8x128xf32>
    %cst_90 = arith.constant 2.000000e-01 : f32
    %186 = vector.broadcast %cst_90 : f32 to vector<8x128xf32>
    %187 = arith.cmpf olt, %185, %186 : vector<8x128xf32>
    %cst_91 = arith.constant 2.500000e+00 : f32
    %188 = vector.broadcast %cst_91 : f32 to vector<8x128xf32>
    %189 = arith.mulf %188, %184 : vector<8x128xf32>
    %190 = arith.mulf %189, %184 : vector<8x128xf32>
    %cst_92 = arith.constant 1.000000e-01 : f32
    %191 = vector.broadcast %cst_92 : f32 to vector<8x128xf32>
    %192 = arith.subf %185, %191 : vector<8x128xf32>
    %193 = arith.select %187, %190, %192 : vector<8x128xi1>, vector<8x128xf32>
    %194 = arith.subf %49, %139 : vector<8x128xf32>
    %195 = math.absf %194 : vector<8x128xf32>
    %cst_93 = arith.constant 2.000000e-01 : f32
    %196 = vector.broadcast %cst_93 : f32 to vector<8x128xf32>
    %197 = arith.cmpf olt, %195, %196 : vector<8x128xf32>
    %cst_94 = arith.constant 2.500000e+00 : f32
    %198 = vector.broadcast %cst_94 : f32 to vector<8x128xf32>
    %199 = arith.mulf %198, %194 : vector<8x128xf32>
    %200 = arith.mulf %199, %194 : vector<8x128xf32>
    %cst_95 = arith.constant 1.000000e-01 : f32
    %201 = vector.broadcast %cst_95 : f32 to vector<8x128xf32>
    %202 = arith.subf %195, %201 : vector<8x128xf32>
    %203 = arith.select %197, %200, %202 : vector<8x128xi1>, vector<8x128xf32>
    %204 = arith.subf %50, %140 : vector<8x128xf32>
    %205 = math.absf %204 : vector<8x128xf32>
    %cst_96 = arith.constant 2.000000e-01 : f32
    %206 = vector.broadcast %cst_96 : f32 to vector<8x128xf32>
    %207 = arith.cmpf olt, %205, %206 : vector<8x128xf32>
    %cst_97 = arith.constant 2.500000e+00 : f32
    %208 = vector.broadcast %cst_97 : f32 to vector<8x128xf32>
    %209 = arith.mulf %208, %204 : vector<8x128xf32>
    %210 = arith.mulf %209, %204 : vector<8x128xf32>
    %cst_98 = arith.constant 1.000000e-01 : f32
    %211 = vector.broadcast %cst_98 : f32 to vector<8x128xf32>
    %212 = arith.subf %205, %211 : vector<8x128xf32>
    %213 = arith.select %207, %210, %212 : vector<8x128xi1>, vector<8x128xf32>
    %214 = arith.mulf %80, %155 : vector<8x128xf32>
    %215 = arith.mulf %65, %170 : vector<8x128xf32>
    %216 = arith.subf %214, %215 : vector<8x128xf32>
    %217 = arith.mulf %65, %155 : vector<8x128xf32>
    %218 = arith.mulf %80, %170 : vector<8x128xf32>
    %219 = arith.addf %217, %218 : vector<8x128xf32>
    %220 = math.atan2 %216, %219 : vector<8x128xf32>
    %cst_99 = arith.constant 5.000000e-01 : f32
    %221 = vector.broadcast %cst_99 : f32 to vector<8x128xf32>
    %222 = arith.mulf %221, %220 : vector<8x128xf32>
    %cst_100 = arith.constant 1.57079637 : f32
    %223 = vector.broadcast %cst_100 : f32 to vector<8x128xf32>
    %224 = arith.addf %222, %223 : vector<8x128xf32>
    %cst_101 = arith.constant 0.318309873 : f32
    %225 = vector.broadcast %cst_101 : f32 to vector<8x128xf32>
    %226 = arith.mulf %224, %225 : vector<8x128xf32>
    %227 = math.floor %226 : vector<8x128xf32>
    %cst_102 = arith.constant 3.14159274 : f32
    %228 = vector.broadcast %cst_102 : f32 to vector<8x128xf32>
    %229 = arith.mulf %227, %228 : vector<8x128xf32>
    %230 = arith.subf %224, %229 : vector<8x128xf32>
    %cst_103 = arith.constant 1.57079637 : f32
    %231 = vector.broadcast %cst_103 : f32 to vector<8x128xf32>
    %232 = arith.subf %230, %231 : vector<8x128xf32>
    %233 = math.absf %232 : vector<8x128xf32>
    %c0_i32_104 = arith.constant 0 : i32
    %234 = arith.cmpi eq, %arg1, %c0_i32_104 : i32
    %c0_i32_105 = arith.constant 0 : i32
    %235 = arith.cmpi eq, %arg2, %c0_i32_105 : i32
    %236 = arith.andi %234, %235 : i1
    %true = arith.constant true
    %237 = arith.xori %236, %true : i1
    %238 = arith.extui %237 : i1 to i32
    %c0_i32_106 = arith.constant 0 : i32
    %239 = arith.cmpi ne, %238, %c0_i32_106 : i32
    scf.if %239 {
      %c0_110 = arith.constant 0 : index
      %c0_111 = arith.constant 0 : index
      %245 = vector.load %arg10[%c0_110, %c0_111] : memref<8x128xf32, #tpu.memory_space<vmem>>, vector<8x128xf32>
      %246 = vector.shape_cast %193 : vector<8x128xf32> to vector<1x8x128xf32>
      %cst_112 = arith.constant dense<0.000000e+00> : vector<8x128xf32>
      %247 = vector.multi_reduction <add>, %246, %cst_112 [0] : vector<1x8x128xf32> to vector<8x128xf32>
      %248 = arith.addf %245, %247 : vector<8x128xf32>
      %c0_113 = arith.constant 0 : index
      %c0_114 = arith.constant 0 : index
      %249 = vector.load %arg10[%c0_113, %c0_114] : memref<8x128xf32, #tpu.memory_space<vmem>>, vector<8x128xf32>
      tpu.vector_store %arg10[%c0_113, %c0_114], %248 {strides = array<i32>} : memref<8x128xf32, #tpu.memory_space<vmem>>, vector<8x128xf32>,
      %c0_115 = arith.constant 0 : index
      %c0_116 = arith.constant 0 : index
      %250 = vector.load %arg11[%c0_115, %c0_116] : memref<8x128xf32, #tpu.memory_space<vmem>>, vector<8x128xf32>
      %251 = vector.shape_cast %233 : vector<8x128xf32> to vector<1x8x128xf32>
      %cst_117 = arith.constant dense<0.000000e+00> : vector<8x128xf32>
      %252 = vector.multi_reduction <add>, %251, %cst_117 [0] : vector<1x8x128xf32> to vector<8x128xf32>
      %253 = arith.addf %250, %252 : vector<8x128xf32>
      %c0_118 = arith.constant 0 : index
      %c0_119 = arith.constant 0 : index
      %254 = vector.load %arg11[%c0_118, %c0_119] : memref<8x128xf32, #tpu.memory_space<vmem>>, vector<8x128xf32>
      tpu.vector_store %arg11[%c0_118, %c0_119], %253 {strides = array<i32>} : memref<8x128xf32, #tpu.memory_space<vmem>>, vector<8x128xf32>,
      %c0_120 = arith.constant 0 : index
      %c0_121 = arith.constant 0 : index
      %255 = vector.load %arg12[%c0_120, %c0_121] : memref<8x128xf32, #tpu.memory_space<vmem>>, vector<8x128xf32>
      %256 = vector.shape_cast %203 : vector<8x128xf32> to vector<1x8x128xf32>
      %cst_122 = arith.constant dense<0.000000e+00> : vector<8x128xf32>
      %257 = vector.multi_reduction <add>, %256, %cst_122 [0] : vector<1x8x128xf32> to vector<8x128xf32>
      %258 = arith.addf %255, %257 : vector<8x128xf32>
      %c0_123 = arith.constant 0 : index
      %c0_124 = arith.constant 0 : index
      %259 = vector.load %arg12[%c0_123, %c0_124] : memref<8x128xf32, #tpu.memory_space<vmem>>, vector<8x128xf32>
      tpu.vector_store %arg12[%c0_123, %c0_124], %258 {strides = array<i32>} : memref<8x128xf32, #tpu.memory_space<vmem>>, vector<8x128xf32>,
      %c0_125 = arith.constant 0 : index
      %c0_126 = arith.constant 0 : index
      %260 = vector.load %arg13[%c0_125, %c0_126] : memref<8x128xf32, #tpu.memory_space<vmem>>, vector<8x128xf32>
      %261 = vector.shape_cast %213 : vector<8x128xf32> to vector<1x8x128xf32>
      %cst_127 = arith.constant dense<0.000000e+00> : vector<8x128xf32>
      %262 = vector.multi_reduction <add>, %261, %cst_127 [0] : vector<1x8x128xf32> to vector<8x128xf32>
      %263 = arith.addf %260, %262 : vector<8x128xf32>
      %c0_128 = arith.constant 0 : index
      %c0_129 = arith.constant 0 : index
      %264 = vector.load %arg13[%c0_128, %c0_129] : memref<8x128xf32, #tpu.memory_space<vmem>>, vector<8x128xf32>
      tpu.vector_store %arg13[%c0_128, %c0_129], %263 {strides = array<i32>} : memref<8x128xf32, #tpu.memory_space<vmem>>, vector<8x128xf32>,
    } else {
    }
    %240 = arith.extui %236 : i1 to i32
    %c0_i32_107 = arith.constant 0 : i32
    %241 = arith.cmpi ne, %240, %c0_i32_107 : i32
    scf.if %241 {
      %245 = tpu.iota {dimensions = array<i32: 0>} : vector<8x128xi32>
      %246 = tpu.iota {dimensions = array<i32: 1>} : vector<8x128xi32>
      %c128_i32 = arith.constant 128 : i32
      %247 = vector.broadcast %c128_i32 : i32 to vector<8x128xi32>
      %248 = arith.muli %245, %247 : vector<8x128xi32>
      %249 = arith.addi %248, %246 : vector<8x128xi32>
      %c256_i32 = arith.constant 256 : i32
      %250 = vector.broadcast %c256_i32 : i32 to vector<8x128xi32>
      %251 = arith.cmpi slt, %249, %250 : vector<8x128xi32>
      %cst_110 = arith.constant 0.000000e+00 : f32
      %252 = vector.broadcast %cst_110 : f32 to vector<8x128xf32>
      %253 = arith.select %251, %193, %252 : vector<8x128xi1>, vector<8x128xf32>
      %254 = arith.select %251, %233, %252 : vector<8x128xi1>, vector<8x128xf32>
      %255 = arith.select %251, %203, %252 : vector<8x128xi1>, vector<8x128xf32>
      %256 = arith.select %251, %213, %252 : vector<8x128xi1>, vector<8x128xf32>
      %c0_111 = arith.constant 0 : index
      %c0_112 = arith.constant 0 : index
      %257 = vector.load %arg10[%c0_111, %c0_112] : memref<8x128xf32, #tpu.memory_space<vmem>>, vector<8x128xf32>
      %258 = vector.shape_cast %253 : vector<8x128xf32> to vector<1x8x128xf32>
      %cst_113 = arith.constant dense<0.000000e+00> : vector<8x128xf32>
      %259 = vector.multi_reduction <add>, %258, %cst_113 [0] : vector<1x8x128xf32> to vector<8x128xf32>
      %260 = arith.addf %257, %259 : vector<8x128xf32>
      %c0_114 = arith.constant 0 : index
      %c0_115 = arith.constant 0 : index
      %261 = vector.load %arg10[%c0_114, %c0_115] : memref<8x128xf32, #tpu.memory_space<vmem>>, vector<8x128xf32>
      tpu.vector_store %arg10[%c0_114, %c0_115], %260 {strides = array<i32>} : memref<8x128xf32, #tpu.memory_space<vmem>>, vector<8x128xf32>,
      %c0_116 = arith.constant 0 : index
      %c0_117 = arith.constant 0 : index
      %262 = vector.load %arg11[%c0_116, %c0_117] : memref<8x128xf32, #tpu.memory_space<vmem>>, vector<8x128xf32>
      %263 = vector.shape_cast %254 : vector<8x128xf32> to vector<1x8x128xf32>
      %cst_118 = arith.constant dense<0.000000e+00> : vector<8x128xf32>
      %264 = vector.multi_reduction <add>, %263, %cst_118 [0] : vector<1x8x128xf32> to vector<8x128xf32>
      %265 = arith.addf %262, %264 : vector<8x128xf32>
      %c0_119 = arith.constant 0 : index
      %c0_120 = arith.constant 0 : index
      %266 = vector.load %arg11[%c0_119, %c0_120] : memref<8x128xf32, #tpu.memory_space<vmem>>, vector<8x128xf32>
      tpu.vector_store %arg11[%c0_119, %c0_120], %265 {strides = array<i32>} : memref<8x128xf32, #tpu.memory_space<vmem>>, vector<8x128xf32>,
      %c0_121 = arith.constant 0 : index
      %c0_122 = arith.constant 0 : index
      %267 = vector.load %arg12[%c0_121, %c0_122] : memref<8x128xf32, #tpu.memory_space<vmem>>, vector<8x128xf32>
      %268 = vector.shape_cast %255 : vector<8x128xf32> to vector<1x8x128xf32>
      %cst_123 = arith.constant dense<0.000000e+00> : vector<8x128xf32>
      %269 = vector.multi_reduction <add>, %268, %cst_123 [0] : vector<1x8x128xf32> to vector<8x128xf32>
      %270 = arith.addf %267, %269 : vector<8x128xf32>
      %c0_124 = arith.constant 0 : index
      %c0_125 = arith.constant 0 : index
      %271 = vector.load %arg12[%c0_124, %c0_125] : memref<8x128xf32, #tpu.memory_space<vmem>>, vector<8x128xf32>
      tpu.vector_store %arg12[%c0_124, %c0_125], %270 {strides = array<i32>} : memref<8x128xf32, #tpu.memory_space<vmem>>, vector<8x128xf32>,
      %c0_126 = arith.constant 0 : index
      %c0_127 = arith.constant 0 : index
      %272 = vector.load %arg13[%c0_126, %c0_127] : memref<8x128xf32, #tpu.memory_space<vmem>>, vector<8x128xf32>
      %273 = vector.shape_cast %256 : vector<8x128xf32> to vector<1x8x128xf32>
      %cst_128 = arith.constant dense<0.000000e+00> : vector<8x128xf32>
      %274 = vector.multi_reduction <add>, %273, %cst_128 [0] : vector<1x8x128xf32> to vector<8x128xf32>
      %275 = arith.addf %272, %274 : vector<8x128xf32>
      %c0_129 = arith.constant 0 : index
      %c0_130 = arith.constant 0 : index
      %276 = vector.load %arg13[%c0_129, %c0_130] : memref<8x128xf32, #tpu.memory_space<vmem>>, vector<8x128xf32>
      tpu.vector_store %arg13[%c0_129, %c0_130], %275 {strides = array<i32>} : memref<8x128xf32, #tpu.memory_space<vmem>>, vector<8x128xf32>,
    } else {
    }
    %c0_i32_108 = arith.constant 0 : i32
    %242 = arith.cmpi eq, %arg2, %c0_i32_108 : i32
    %243 = arith.extui %242 : i1 to i32
    %c0_i32_109 = arith.constant 0 : i32
    %244 = arith.cmpi ne, %243, %c0_i32_109 : i32
    scf.if %244 {
      %c0_110 = arith.constant 0 : index
      %c0_111 = arith.constant 0 : index
      %245 = vector.load %arg10[%c0_110, %c0_111] : memref<8x128xf32, #tpu.memory_space<vmem>>, vector<8x128xf32>
      %246 = vector.shape_cast %245 : vector<8x128xf32> to vector<1x8x128xf32>
      %cst_112 = arith.constant dense<0.000000e+00> : vector<1xf32>
      %247 = vector.multi_reduction <add>, %246, %cst_112 [1, 2] : vector<1x8x128xf32> to vector<1xf32>
      %248 = vector.shape_cast %247 : vector<1xf32> to vector<1x1x1xf32>
      %249 = vector.extract %248[0, 0, 0] : f32 from vector<1x1x1xf32>
      %250 = vector.broadcast %249 : f32 to vector<1x1x1xf32>
      %c0_113 = arith.constant 0 : index
      %c0_114 = arith.constant 0 : index
      %c0_115 = arith.constant 0 : index
      %251 = vector.load %arg6[%c0_113, %c0_114, %c0_115] : memref<1x1x1xf32, #tpu.memory_space<vmem>>, vector<1x1x1xf32>
      tpu.vector_store %arg6[%c0_113, %c0_114, %c0_115], %250 {strides = array<i32>} : memref<1x1x1xf32, #tpu.memory_space<vmem>>, vector<1x1x1xf32>,
      %c0_116 = arith.constant 0 : index
      %c0_117 = arith.constant 0 : index
      %252 = vector.load %arg11[%c0_116, %c0_117] : memref<8x128xf32, #tpu.memory_space<vmem>>, vector<8x128xf32>
      %253 = vector.shape_cast %252 : vector<8x128xf32> to vector<1x8x128xf32>
      %cst_118 = arith.constant dense<0.000000e+00> : vector<1xf32>
      %254 = vector.multi_reduction <add>, %253, %cst_118 [1, 2] : vector<1x8x128xf32> to vector<1xf32>
      %255 = vector.shape_cast %254 : vector<1xf32> to vector<1x1x1xf32>
      %256 = vector.extract %255[0, 0, 0] : f32 from vector<1x1x1xf32>
      %257 = vector.broadcast %256 : f32 to vector<1x1x1xf32>
      %c0_119 = arith.constant 0 : index
      %c0_120 = arith.constant 0 : index
      %c0_121 = arith.constant 0 : index
      %258 = vector.load %arg7[%c0_119, %c0_120, %c0_121] : memref<1x1x1xf32, #tpu.memory_space<vmem>>, vector<1x1x1xf32>
      tpu.vector_store %arg7[%c0_119, %c0_120, %c0_121], %257 {strides = array<i32>} : memref<1x1x1xf32, #tpu.memory_space<vmem>>, vector<1x1x1xf32>,
      %c0_122 = arith.constant 0 : index
      %c0_123 = arith.constant 0 : index
      %259 = vector.load %arg12[%c0_122, %c0_123] : memref<8x128xf32, #tpu.memory_space<vmem>>, vector<8x128xf32>
      %260 = vector.shape_cast %259 : vector<8x128xf32> to vector<1x8x128xf32>
      %cst_124 = arith.constant dense<0.000000e+00> : vector<1xf32>
      %261 = vector.multi_reduction <add>, %260, %cst_124 [1, 2] : vector<1x8x128xf32> to vector<1xf32>
      %262 = vector.shape_cast %261 : vector<1xf32> to vector<1x1x1xf32>
      %263 = vector.extract %262[0, 0, 0] : f32 from vector<1x1x1xf32>
      %264 = vector.broadcast %263 : f32 to vector<1x1x1xf32>
      %c0_125 = arith.constant 0 : index
      %c0_126 = arith.constant 0 : index
      %c0_127 = arith.constant 0 : index
      %265 = vector.load %arg8[%c0_125, %c0_126, %c0_127] : memref<1x1x1xf32, #tpu.memory_space<vmem>>, vector<1x1x1xf32>
      tpu.vector_store %arg8[%c0_125, %c0_126, %c0_127], %264 {strides = array<i32>} : memref<1x1x1xf32, #tpu.memory_space<vmem>>, vector<1x1x1xf32>,
      %c0_128 = arith.constant 0 : index
      %c0_129 = arith.constant 0 : index
      %266 = vector.load %arg13[%c0_128, %c0_129] : memref<8x128xf32, #tpu.memory_space<vmem>>, vector<8x128xf32>
      %267 = vector.shape_cast %266 : vector<8x128xf32> to vector<1x8x128xf32>
      %cst_130 = arith.constant dense<0.000000e+00> : vector<1xf32>
      %268 = vector.multi_reduction <add>, %267, %cst_130 [1, 2] : vector<1x8x128xf32> to vector<1xf32>
      %269 = vector.shape_cast %268 : vector<1xf32> to vector<1x1x1xf32>
      %270 = vector.extract %269[0, 0, 0] : f32 from vector<1x1x1xf32>
      %271 = vector.broadcast %270 : f32 to vector<1x1x1xf32>
      %c0_131 = arith.constant 0 : index
      %c0_132 = arith.constant 0 : index
      %c0_133 = arith.constant 0 : index
      %272 = vector.load %arg9[%c0_131, %c0_132, %c0_133] : memref<1x1x1xf32, #tpu.memory_space<vmem>>, vector<1x1x1xf32>
      tpu.vector_store %arg9[%c0_131, %c0_132, %c0_133], %271 {strides = array<i32>} : memref<1x1x1xf32, #tpu.memory_space<vmem>>, vector<1x1x1xf32>,
    } else {
    }
    return
  }
  func.func @transform_0(%arg0: i32, %arg1: i32, %arg2: i32) -> (i32, i32) {
    %c0_i32 = arith.constant 0 : i32
    %c0_i32_0 = arith.constant 0 : i32
    %c0_i32_1 = arith.constant 0 : i32
    return %c0_i32, %c0_i32_0 : i32, i32
  }
  func.func @transform_1(%arg0: i32, %arg1: i32, %arg2: i32) -> (i32, i32, i32, i32) {
    %c1_i32 = arith.constant 1 : i32
    %0 = arith.muli %arg1, %c1_i32 : i32
    %1 = arith.addi %0, %arg2 : i32
    %c0_i32 = arith.constant 0 : i32
    %c0_i32_0 = arith.constant 0 : i32
    %c0_i32_1 = arith.constant 0 : i32
    return %arg0, %c0_i32, %1, %c0_i32_0 : i32, i32, i32, i32
  }
  func.func @transform_2(%arg0: i32, %arg1: i32, %arg2: i32) -> (i32, i32, i32, i32) {
    %c1_i32 = arith.constant 1 : i32
    %0 = arith.muli %arg1, %c1_i32 : i32
    %1 = arith.addi %0, %arg2 : i32
    %c0_i32 = arith.constant 0 : i32
    %c0_i32_0 = arith.constant 0 : i32
    %c0_i32_1 = arith.constant 0 : i32
    return %arg0, %c0_i32, %1, %c0_i32_0 : i32, i32, i32, i32
  }
  func.func @transform_3(%arg0: i32, %arg1: i32, %arg2: i32) -> (i32, i32, i32) {
    %c1_i32 = arith.constant 1 : i32
    %0 = arith.muli %arg0, %c1_i32 : i32
    %1 = arith.addi %0, %arg1 : i32
    %c0_i32 = arith.constant 0 : i32
    %c0_i32_0 = arith.constant 0 : i32
    %c0_i32_1 = arith.constant 0 : i32
    return %1, %c0_i32, %c0_i32_0 : i32, i32, i32
  }
  func.func @transform_4(%arg0: i32, %arg1: i32, %arg2: i32) -> (i32, i32, i32) {
    %c1_i32 = arith.constant 1 : i32
    %0 = arith.muli %arg0, %c1_i32 : i32
    %1 = arith.addi %0, %arg1 : i32
    %c0_i32 = arith.constant 0 : i32
    %c0_i32_0 = arith.constant 0 : i32
    %c0_i32_1 = arith.constant 0 : i32
    return %1, %c0_i32, %c0_i32_0 : i32, i32, i32
  }
  func.func @transform_5(%arg0: i32, %arg1: i32, %arg2: i32) -> (i32, i32, i32) {
    %c1_i32 = arith.constant 1 : i32
    %0 = arith.muli %arg0, %c1_i32 : i32
    %1 = arith.addi %0, %arg1 : i32
    %c0_i32 = arith.constant 0 : i32
    %c0_i32_0 = arith.constant 0 : i32
    %c0_i32_1 = arith.constant 0 : i32
    return %1, %c0_i32, %c0_i32_0 : i32, i32, i32
  }
  func.func @transform_6(%arg0: i32, %arg1: i32, %arg2: i32) -> (i32, i32, i32) {
    %c1_i32 = arith.constant 1 : i32
    %0 = arith.muli %arg0, %c1_i32 : i32
    %1 = arith.addi %0, %arg1 : i32
    %c0_i32 = arith.constant 0 : i32
    %c0_i32_0 = arith.constant 0 : i32
    %c0_i32_1 = arith.constant 0 : i32
    return %1, %c0_i32, %c0_i32_0 : i32, i32, i32
  }
}

</mosaic_0001>

<bundles_post_ra>
// kernel: loss_aop_dop.1
= control target key start
LH: loop header
LB: loop body
LE: loop exit
PB: predicated region body
PF: predicated region fallthrough
CT: control target
= control target key end

     0   :  { %s989_s23 = smov 0   ;;  %s991_s24 = smov 0   ;;  %s1130_s0 = inlined_call_operand.<no memory space> [shape: f32[1,1], index: 0, kind: input, shape index: {}]   ;;  %s1131_s1 = inlined_call_operand.vmem [shape: f32[2,4,8,128], index: 1, kind: input, shape index: {}]   ;;  %s1132_s2 = inlined_call_operand.vmem [shape: f32[2,4,8,128], index: 2, kind: input, shape index: {}]   ;;  %s1133_s3 = inlined_call_operand.vmem [shape: f32[2,1,1], index: 3, kind: output, shape index: {0}]   ;;  %s1134_s4 = inlined_call_operand.vmem [shape: f32[2,1,1], index: 4, kind: output, shape index: {1}]   ;;  %s1135_s5 = inlined_call_operand.vmem [shape: f32[2,1,1], index: 5, kind: output, shape index: {2}]   ;;  %s1136_s6 = inlined_call_operand.vmem [shape: f32[2,1,1], index: 6, kind: output, shape index: {3}]  }
   0x1   :  { %12 = sst [smem:[#allocation6]] %s1130_s0  ;;  %s993_s25 = smov 0  }
   0x2 LB: > { %s37_s0 = sadd.s32 1, %s943_s24  ;;  %p862_p0 = scmp.ge.s32.totalorder %s947_s25, 1  ;;  %s947_s25 = sphi %s993_s25, %s18_s25   ;;  %s943_s24 = sphi %s991_s24, %s1142_s24   ;;  %s939_s23 = sphi %s989_s23, %s1141_s23  }
   0x3   : > { %p39_p1 = scmp.ge.s32.totalorder %s37_s0, 2  ;;  %p275_p2 = scmp.lt.s32.totalorder %s947_s25, 3 }
   0x5   : > { %s1144_s0 = smov (%p39_p1, %s37_s0), 0  ;;  %p276_p3 = pnand %p862_p0, %p275_p2 }
   0x6   : > { %p330_p4 = scmp.lt.s32.totalorder (!%p276_p3), %s939_s23, 1  ;;  %s377_s26 = sld [smem:[#allocation6]] (!%p276_p3)  ;;  %v590_v0 = vlaneseq (!%p276_p3) }
   0x7   : > { %279 = sbr.rel (%p276_p3) target bundleno = 344 (0x158), region = 32 }
   0x8   : > { %v591_v1 = vshrl.u32 (!%p276_p3), %v590_v0, 7  ;;  %v593_v12 = vand.u32 (!%p276_p3), 127, %v590_v0  ;;  %v949_v0 = vmov (!%p276_p3), 0.0  }
   0xa   : > { %v594_v17 = vmul.u32 (!%p276_p3), 128, %v591_v1 }
   0xc   : > { %v379_v3 = vstv (!%p276_p3), %s377_s26  ;;  %v1018_v43 = vadd.s32 (!%p276_p3), %v594_v17, %v593_v12 }
   0xe   : > { %s1146_s23 = smov (!%p330_p4, %s939_s23), 1  ;;  %vm596_vm8 = vcmp.lt.s32.totalorder %v1018_v43, 256 }
   0xf   : > { %s879_s27 = sshll.u32 %s1146_s23, 5  ;;  %s352_s12 = scalar_lea.vmem %s1133_s3, %s1146_s23 }
  0x10   : > { %s337_s30 = scalar_lea.vmem %s1131_s1, %s879_s27  ;;  %s347_s9 = scalar_lea.vmem %s1132_s2, %s879_s27 }
  0x11   : > { %v378_v2 = vld [vmem:[%s337_s30] sm:$0xff]  ;;  %v867_v4 = vld [vmem:[%s337_s30 + $0x8] sm:$0xff]  ;;  %v868_v5 = vld [vmem:[%s337_s30 + $0x10] sm:$0xff]  ;;  %s357_s16 = scalar_lea.vmem %s1134_s4, %s1146_s23  ;;  %s362_s20 = scalar_lea.vmem %s1135_s5, %s1146_s23 }
  0x12   : > { %v380_v6 = vmul.f32 %v379_v3, %v378_v2  ;;  %v387_v7 = vmul.f32 %v867_v4, %v379_v3  ;;  %v394_v8 = vmul.f32 %v868_v5, %v379_v3  ;;  %v869_v9 = vld [vmem:[%s337_s30 + $0x18] sm:$0xff]  ;;  %v441_v10 = vld [vmem:[%s347_s9] sm:$0xff]  ;;  %v870_v11 = vld [vmem:[%s347_s9 + $0x8] sm:$0xff]  ;;  %s367_s27 = scalar_lea.vmem %s1136_s6, %s1146_s23 }
  0x13   : > { %v401_v13 = vmul.f32 %v869_v9, %v379_v3  ;;  %v442_v14 = vmul.f32 %v441_v10, %v379_v3  ;;  %v449_v15 = vmul.f32 %v870_v11, %v379_v3  ;;  %v871_v16 = vld [vmem:[%s347_s9 + $0x10] sm:$0xff]  ;;  %v872_v19 = vld [vmem:[%s347_s9 + $0x18] sm:$0xff] }
  0x14   : > { %vm381_vm0 = vcmp.ne.f32.partialorder %v380_v6, %v380_v6  ;;  %vm388_vm1 = vcmp.ne.f32.partialorder %v387_v7, %v387_v7  ;;  %vm395_vm2 = vcmp.ne.f32.partialorder %v394_v8, %v394_v8  ;;  %v456_v18 = vmul.f32 %v871_v16, %v379_v3 }
  0x15   : > { %v382_v20 = vsel %vm381_vm0, 1e-06, %v380_v6  ;;  %v389_v21 = vsel %vm388_vm1, 1e-06, %v387_v7  ;;  %v396_v22 = vsel %vm395_vm2, 1e-06, %v394_v8  ;;  %vm402_vm3 = vcmp.ne.f32.partialorder %v401_v13, %v401_v13 }
  0x16   : > { %v383_v23 = vmax.f32 %v382_v20, 1e-06  ;;  %v390_v24 = vmax.f32 %v389_v21, 1e-06  ;;  %v397_v25 = vmax.f32 %v396_v22, 1e-06  ;;  %vm443_vm4 = vcmp.ne.f32.partialorder %v442_v14, %v442_v14 }
  0x17   : > { %v403_v26 = vsel %vm402_vm3, 1e-06, %v401_v13  ;;  %v444_v27 = vsel %vm443_vm4, 1e-06, %v442_v14  ;;  %vm450_vm5 = vcmp.ne.f32.partialorder %v449_v15, %v449_v15  ;;  %vm457_vm6 = vcmp.ne.f32.partialorder %v456_v18, %v456_v18 }
  0x18   : > { %v384_v28 = vmin.f32 %v383_v23, 0.999999  ;;  %v391_v29 = vmin.f32 %v390_v24, 0.999999  ;;  %v398_v30 = vmin.f32 %v397_v25, 0.999999  ;;  %v463_v31 = vmul.f32 %v872_v19, %v379_v3 }
  0x19   : > { %v404_v32 = vmax.f32 %v403_v26, 1e-06  ;;  %v445_v33 = vmax.f32 %v444_v27, 1e-06  ;;  %v451_v34 = vsel %vm450_vm5, 1e-06, %v449_v15 }
  0x1a   : > { %v452_v35 = vmax.f32 %v451_v34, 1e-06  ;;  %v458_v36 = vsel %vm457_vm6, 1e-06, %v456_v18  ;;  %vm464_vm7 = vcmp.ne.f32.partialorder %v463_v31, %v463_v31  ;;  %v1016_v38 = vsub.f32 %v384_v28, %v398_v30 }
  0x1b   : > { %v405_v37 = vmin.f32 %v404_v32, 0.999999  ;;  %v446_v39 = vmin.f32 %v445_v33, 0.999999  ;;  %v459_v40 = vmax.f32 %v458_v36, 1e-06  ;;  %v406_v44 = vadd.f32 %v398_v30, %v384_v28 }
  0x1c   : > { %v453_v41 = vmin.f32 %v452_v35, 0.999999  ;;  %v465_v42 = vsel %vm464_vm7, 1e-06, %v463_v31  ;;  %v425_v48 = vmul.f32 %v1016_v38, %v1016_v38  ;;  %v409_v53 = vand.u32 2147483647, %v1016_v38 }
  0x1d   : > { %v1020_v45 = vsub.f32 %v391_v29, %v405_v37  ;;  %v460_v46 = vmin.f32 %v459_v40, 0.999999  ;;  %v466_v47 = vmax.f32 %v465_v42, 1e-06  ;;  %v436_v52 = vadd.f32 1e-06, %v406_v44 }
  0x1e   : > { %vm412_vm9 = vcmp.lt.f32.partialorder %v1016_v38, 0.0  ;;  %vm411_vm10 = vcmp.gt.f32.partialorder %v1016_v38, 0.0  ;;  %vm1056_vm15 = vcmp.lt.f32.partialorder %v409_v53, 1e-06 }
  0x1f   : > { %v467_v49 = vmin.f32 %v466_v47, 0.999999  ;;  %v1024_v50 = vsub.f32 %v446_v39, %v460_v46  ;;  %v426_v51 = vmul.f32 %v1020_v45, %v1020_v45  ;;  %v468_v57 = vadd.f32 %v460_v46, %v446_v39 }
  0x20   : > { %vm420_vm11 = vcmp.lt.f32.partialorder %v1020_v45, 0.0  ;;  %v413_v1 = vsel %vm412_vm9, -1.0, %v949_v0  ;;  %vm419_vm12 = vcmp.gt.f32.partialorder %v1020_v45, 0.0  ;;  %v417_v7 = vand.u32 2147483647, %v1020_v45 }
  0x21   : > { %v1030_v54 = vsub.f32 %v453_v41, %v467_v49  ;;  %v510_v55 = vsub.f32 %v1016_v38, %v1024_v50  ;;  %v427_v56 = vadd.f32 %v426_v51, %v425_v48  ;;  %v487_v58 = vmul.f32 %v1024_v50, %v1024_v50 }
  0x22   : > { %v421_v2 = vsel %vm420_vm11, -1.0, %v949_v0  ;;  %v498_v6 = vadd.f32 1e-06, %v468_v57  ;;  %v414_v11 = vsel %vm411_vm10, 1.0, %v413_v1  ;;  %vm1060_vm0 = vcmp.lt.f32.partialorder %v417_v7, 1e-06 }
  0x23   : > { %v511_v59 = vand.u32 2147483647, %v510_v55  ;;  %v513_v60 = vmul.f32 2.5, %v510_v55  ;;  %v1039_v61 = vadd.f32 1e-06, %v427_v56  ;;  %v488_v62 = vmul.f32 %v1030_v54, %v1030_v54 }
  0x24   : > { %v517_v63 = vsub.f32 %v1020_v45, %v1030_v54  ;;  %v422_v14 = vsel %vm419_vm12, 1.0, %v421_v2  ;;  %v415_v18 = vmul.f32 1e-06, %v414_v11  ;;  %v471_v20 = vand.u32 2147483647, %v1024_v50 }
  0x25   : > { %vm512_vm13 = vcmp.lt.f32.partialorder %v511_v59, 0.2  ;;  %v514_v3 = vmul.f32 %v513_v60, %v510_v55  ;;  %v874_v4 = vadd.f32 -0.1, %v511_v59  ;;  %915 = vrsqrt.f32 %v1039_v61 }
  0x26   : > { %917 = vrcp.f32 %v436_v52  ;;  %v489_v5 = vadd.f32 %v488_v62, %v487_v58  ;;  %v518_v9 = vand.u32 2147483647, %v517_v63  ;;  %v520_v10 = vmul.f32 2.5, %v517_v63 }
  0x27   : > { %v516_v8 = vsel %vm512_vm13, %v514_v3, %v874_v4  ;;  %v423_v22 = vmul.f32 1e-06, %v422_v14  ;;  %vm473_vm1 = vcmp.gt.f32.partialorder %v1024_v50, 0.0  ;;  %vm474_vm2 = vcmp.lt.f32.partialorder %v1024_v50, 0.0 }
  0x28   : > { %v599_v12 = vsel %vm596_vm8, %v516_v8, 0.0  ;;  %v490_v13 = vadd.f32 1e-06, %v489_v5  ;;  %vm519_vm14 = vcmp.lt.f32.partialorder %v518_v9, 0.2  ;;  %v521_v15 = vmul.f32 %v520_v10, %v517_v63 }
  0x29   : > { %665 = vadd.xlane.f32.xlu1 %v599_v12  ;;  %v875_v16 = vadd.f32 -0.1, %v518_v9  ;;  %v479_v24 = vand.u32 2147483647, %v1030_v54  ;;  %vm481_vm3 = vcmp.gt.f32.partialorder %v1030_v54, 0.0  ;;  %vm431_vm4 = vcmp.eq.f32.partialorder %v1039_v61, inf }
  0x2a   : > { %919 = vrsqrt.f32 %v490_v13  ;;  %v434_v25 = vand.u32 2147483648, %v1039_v61  ;;  %v475_v26 = vsel %vm474_vm2, -1.0, %v949_v0  ;;  %vm482_vm5 = vcmp.lt.f32.partialorder %v1030_v54, 0.0 }
  0x2b   : > { %921 = vrcp.f32 %v498_v6  ;;  %v523_v21 = vsel %vm519_vm14, %v521_v15, %v875_v16  ;;  %v416_v27 = vsel %vm1056_vm15, %v415_v18, %v1016_v38  ;;  %vm472_vm6 = vcmp.lt.f32.partialorder %v471_v20, 1e-06 }
  0x2c   : > { %v600_v23 = vsel %vm596_vm8, %v523_v21, 0.0  ;;  %v476_v28 = vsel %vm473_vm1, 1.0, %v475_v26  ;;  %v483_v29 = vsel %vm482_vm5, -1.0, %v949_v0  ;;  %v424_v31 = vsel %vm1060_vm0, %v423_v22, %v1020_v45 }
  0x2d   : > { %677 = vadd.xlane.f32.xlu1 %v600_v23  ;;  %v477_v32 = vmul.f32 1e-06, %v476_v28  ;;  %vm480_vm7 = vcmp.lt.f32.partialorder %v479_v24, 1e-06  ;;  %v484_v33 = vsel %vm481_vm3, 1.0, %v483_v29  ;;  %vm433_vm9 = vcmp.eq.f32.partialorder %v1039_v61, 0.0 }
  0x2e   : > { %v485_v36 = vmul.f32 1e-06, %v484_v33  ;;  %vm493_vm10 = vcmp.eq.f32.partialorder %v490_v13, inf  ;;  %v496_v48 = vand.u32 2147483648, %v490_v13  ;;  %vm495_vm11 = vcmp.eq.f32.partialorder %v490_v13, 0.0 }
  0x2f   : > { %v916_v30 = vpop.eup %915  ;;  %v478_v37 = vsel %vm472_vm6, %v477_v32, %v1024_v50  ;;  %v950_v33 = vmov 0.7853982  }
  0x30   : > { %v918_v34 = vpop.eup %917  ;;  %v430_v35 = vmul.f32 %v916_v30, %v1039_v61  ;;  %v486_v39 = vsel %vm480_vm7, %v485_v36, %v1030_v54  ;;  %v524_v40 = vmul.f32 %v478_v37, %v424_v31  ;;  %v527_v41 = vmul.f32 %v478_v37, %v416_v27 }
  0x31   : > { %v525_v44 = vmul.f32 %v486_v39, %v416_v27  ;;  %v528_v45 = vmul.f32 %v486_v39, %v424_v31  ;;  %vm650_vm7 = vcmask 0  }
  0x32   : > { %v432_v38 = vsel %vm431_vm4, %v1039_v61, %v430_v35 }
  0x33   : > { %v435_v42 = vsel %vm433_vm9, %v434_v25, %v432_v38  ;;  %v1089_v52 = vsub.f32 %v524_v40, %v525_v44  ;;  %v529_v50 = vadd.f32 %v528_v45, %v527_v41 }
  0x34   : > { %v920_v46 = vpop.eup %919  ;;  %v438_v47 = vmul.f32 %v918_v34, %v435_v42 }
  0x35   : > { %v922_v49 = vpop.eup %921  ;;  %v492_v51 = vmul.f32 %v920_v46, %v490_v13  ;;  %v530_v56 = vand.u32 2147483647, %v529_v50  ;;  %v531_v54 = vand.u32 2147483647, %v1089_v52  ;;  %vm560_vm14 = vcmp.lt.s32.totalorder %v529_v50, 0 }
  0x36   : > { %v439_v53 = vmax.f32 %v438_v47, 0.0  ;;  %vm564_vm15 = vcmp.ne.f32.partialorder %v529_v50, %v529_v50  ;;  %vm565_vm0 = vcmp.ne.f32.partialorder %v1089_v52, %v1089_v52  ;;  %vm557_vm1 = vcmp.lt.f32.partialorder %v529_v50, 0.0 }
  0x37   : > { %v494_v55 = vsel %vm493_vm10, %v490_v13, %v492_v51  ;;  %v533_v59 = vmax.f32 %v530_v56, %v531_v54  ;;  %v532_v3 = vmin.f32 %v530_v56, %v531_v54  ;;  %vm554_vm13 = vcmp.gt.f32.partialorder %v531_v54, %v530_v56  ;;  %vm566_vm5 = vmor %vm564_vm15, %vm565_vm0 }
  0x38   : > { %v497_v57 = vsel %vm495_vm11, %v496_v48, %v494_v55  ;;  %v440_v60 = vmin.f32 %v439_v53, 1.0  ;;  %vm570_vm2 = vcmp.eq.s32.totalorder %v530_v56, inf  ;;  %vm571_vm3 = vcmp.eq.s32.totalorder %v531_v54, inf }
  0x39   : > { %v500_v58 = vmul.f32 %v922_v49, %v497_v57  ;;  %923 = vrcp.f32 %v533_v59  ;;  %v561_v31 = vsel %vm560_vm14, 3.1415927, %v949_v0  ;;  %vm562_vm4 = vcmp.eq.f32.partialorder %v1089_v52, 0.0  ;;  %vm572_vm6 = vmand %vm570_vm2, %vm571_vm3 }
  0x3a   : > { %v569_v34 = vsel %vm557_vm1, 2.3561945, %v950_v33  ;;  %v575_v37 = vand.u32 2147483648, %v1089_v52 }
  0x3b   : > { %v501_v61 = vmax.f32 %v500_v58, 0.0 }
  0x3d   : > { %v502_v62 = vmin.f32 %v501_v61, 1.0 }
  0x3f   : > { %v503_v63 = vsub.f32 %v440_v60, %v502_v62 }
  0x41   : > { %v504_v1 = vand.u32 2147483647, %v503_v63  ;;  %v506_v2 = vmul.f32 2.5, %v503_v63 }
  0x43   : > { %vm505_vm12 = vcmp.lt.f32.partialorder %v504_v1, 0.2  ;;  %v507_v4 = vmul.f32 %v506_v2, %v503_v63  ;;  %v873_v5 = vadd.f32 -0.1, %v504_v1  ;;  %v924_v6 = vpop.eup %923 }
  0x44   : > { %v535_v9 = vmul.f32 %v924_v6, %v532_v3 }
  0x45   : > { %v509_v7 = vsel %vm505_vm12, %v507_v4, %v873_v5 }
  0x46   : > { %v597_v8 = vsel %vm596_vm8, %v509_v7, 0.0  ;;  %v536_v10 = vmul.f32 %v535_v9, %v535_v9 }
  0x47   : > { %640 = vadd.xlane.f32.xlu0 %v597_v8 }
  0x48   : > { %v537_v11 = vmul.f32 0.002785687, %v536_v10 }
  0x4a   : > { %v538_v12 = vadd.f32 -0.015866, %v537_v11 }
  0x4c   : > { %v539_v13 = vmul.f32 %v538_v12, %v536_v10 }
  0x4e   : > { %v540_v14 = vadd.f32 0.04247222, %v539_v13 }
  0x50   : > { %v541_v15 = vmul.f32 %v540_v14, %v536_v10 }
  0x52   : > { %v542_v16 = vadd.f32 -0.074975304, %v541_v15 }
  0x54   : > { %v543_v17 = vmul.f32 %v542_v16, %v536_v10 }
  0x56   : > { %v544_v18 = vadd.f32 0.1064488, %v543_v17 }
  0x58   : > { %v545_v19 = vmul.f32 %v544_v18, %v536_v10 }
  0x5a   : > { %v546_v20 = vadd.f32 -0.14207031, %v545_v19 }
  0x5c   : > { %v547_v21 = vmul.f32 %v546_v20, %v536_v10 }
  0x5e   : > { %v548_v22 = vadd.f32 0.19993454, %v547_v21 }
  0x60   : > { %v549_v23 = vmul.f32 %v548_v22, %v536_v10 }
  0x62   : > { %v550_v24 = vadd.f32 -0.33333147, %v549_v23 }
  0x64   : > { %v551_v25 = vmul.f32 %v550_v24, %v536_v10 }
  0x66   : > { %v552_v26 = vmul.f32 %v551_v25, %v535_v9 }
  0x68   : > { %v553_v27 = vadd.f32 %v552_v26, %v535_v9 }
  0x6a   : > { %v555_v28 = vsub.f32 1.5707964, %v553_v27 }
  0x6c   : > { %v556_v29 = vsel %vm554_vm13, %v555_v28, %v553_v27 }
  0x6d   : > { %v558_v30 = vsub.f32 3.1415927, %v556_v29 }
  0x6f   : > { %v559_v32 = vsel %vm557_vm1, %v558_v30, %v556_v29 }
  0x70   : > { %v563_v35 = vsel %vm562_vm4, %v561_v31, %v559_v32 }
  0x71   : > { %v567_v36 = vsel %vm566_vm5, nan, %v563_v35 }
  0x72   : > { %v573_v38 = vsel %vm572_vm6, %v569_v34, %v567_v36 }
  0x73   : > { %v574_v39 = vand.u32 2147483647, %v573_v38 }
  0x75   : > { %v576_v40 = vor.u32 %v575_v37, %v574_v39 }
  0x77   : > { %v577_v41 = vmul.f32 0.5, %v576_v40 }
  0x79   : > { %v578_v42 = vadd.f32 1.5707964, %v577_v41 }
  0x7b   : > { %v579_v44 = vmul.f32 0.31830987, %v578_v42 }
  0x7d   : > { %v580_v45 = vfloor.f32 %v579_v44 }
  0x7f   : > { %v581_v46 = vmul.f32 3.1415927, %v580_v45 }
  0x81   : > { %v582_v0 = vsub.f32 %v578_v42, %v581_v46 }
  0x83   : > { %v876_v47 = vadd.f32 -1.5707964, %v582_v0 }
  0x85   : > { %v584_v48 = vand.u32 2147483647, %v876_v47 }
  0x87   : > { %v598_v49 = vsel %vm596_vm8, %v584_v48, 0.0 }
  0x88   : > { %653 = vadd.xlane.f32.xlu0 %v598_v49 }
  0xb6   : > { %v666_v57 = vpop.xlane.xlu1 %665 }
  0xb7   : > { %v667_v59 = vrot.slane %v666_v57, 4 }
  0xb9   : > { %v668_v43 = vadd.f32 %v667_v59, %v666_v57 }
  0xba   : > { %v678_v58 = vpop.xlane.xlu1 %677 }
  0xbb   : > { %v679_v60 = vrot.slane %v678_v58, 4  ;;  %v669_v63 = vrot.slane %v668_v43, 2 }
  0xbd   : > { %v680_v62 = vadd.f32 %v679_v60, %v678_v58  ;;  %v670_v5 = vadd.f32 %v669_v63, %v668_v43 }
  0xbf   : > { %v681_v2 = vrot.slane %v680_v62, 2  ;;  %v671_v9 = vrot.slane %v670_v5, 1 }
  0xc1   : > { %v682_v6 = vadd.f32 %v681_v2, %v680_v62  ;;  %v672_v13 = vadd.f32 %v671_v9, %v670_v5 }
  0xc3   : > { %v683_v11 = vrot.slane %v682_v6, 1 }
  0xc5   : > { %v684_v14 = vadd.f32 %v683_v11, %v682_v6 }
  0xd4   : > { %v641_v51 = vpop.xlane.xlu0 %640 }
  0xd5   : > { %v642_v50 = vrot.slane %v641_v51, 4 }
  0xd7   : > { %v643_v53 = vadd.f32 %v642_v50, %v641_v51 }
  0xd9   : > { %v644_v52 = vrot.slane %v643_v53, 2 }
  0xdb   : > { %v645_v55 = vadd.f32 %v644_v52, %v643_v53 }
  0xdd   : > { %v646_v56 = vrot.slane %v645_v55, 1 }
  0xdf   : > { %v647_v54 = vadd.f32 %v646_v56, %v645_v55 }
  0xe1   : > { %881 = vpush %v647_v54 }
 0x112   : > { %s882_s13 = spop %881 }
 0x113   : > { %v649_v61 = vstv %s882_s13 }
 0x114   : > { %651 = vst.msk [vmem:[%s352_s12] sm:$0x1] %vm650_vm7, %v649_v61 }
 0x115   : > { %v654_v1 = vpop.xlane.xlu0 %653 }
 0x116   : > { %v655_v3 = vrot.slane %v654_v1, 4 }
 0x118   : > { %v656_v4 = vadd.f32 %v655_v3, %v654_v1 }
 0x11a   : > { %v657_v7 = vrot.slane %v656_v4, 2 }
 0x11c   : > { %v658_v8 = vadd.f32 %v657_v7, %v656_v4 }
 0x11e   : > { %v659_v10 = vrot.slane %v658_v8, 1 }
 0x120   : > { %v660_v12 = vadd.f32 %v659_v10, %v658_v8 }
 0x122   : > { %883 = vpush %v660_v12 }
 0x123   : > { %885 = vpush %v672_v13 }
 0x124   : > { %887 = vpush %v684_v14 }
 0x153   : > { %s884_s17 = spop %883 }
 0x154   : > { %v662_v15 = vstv %s884_s17  ;;  %s886_s21 = spop %885 }
 0x155   : > { %663 = vst.msk [vmem:[%s357_s16] sm:$0x1] %vm650_vm7, %v662_v15  ;;  %v674_v16 = vstv %s886_s21  ;;  %s888_s28 = spop %887 }
 0x156   : > { %675 = vst.msk [vmem:[%s362_s20] sm:$0x1] %vm650_vm7, %v674_v16  ;;  %v686_v17 = vstv %s888_s28 }
 0x157   : > { %687 = vst.msk [vmem:[%s367_s27] sm:$0x1] %vm650_vm7, %v686_v17 }
 0x158 PF: > { %s18_s25 = sadd.s32 1, %s947_s25   ;;  %s1141_s23 = smov %s943_s24 }
 0x159   : > { %p15_p5 = scmp.ge.s32.totalorder %s18_s25, 4   ;;  %s1142_s24 = smov %s1144_s0 }
 0x15b   :  { %17 = sbr.rel (!%p15_p5) target bundleno = 2 (0x2), region = 123 }

</bundles_post_ra>
